<compile_context>
chip_gen: v6e
topology: v6e:2x2x1
jax: 0.10.0
libtpu: 0.0.40
codegen_flags: <defaults>
</compile_context>

<pallas_src>
import functools

import jax
import jax.numpy as jnp
from jax.experimental import pallas as pl
from jax.experimental.pallas import tpu as pltpu


def _sgd_loss_kernel(s_ref, t_ref, ws_ref, wt_ref, row_ref, col_ref,
                     params_ref, a_ref, g_ref, *, H, W):
    # s_ref, t_ref : (1, C, HW) native dtype (one image per grid step)
    # ws_ref/wt_ref: (16, C) f32  (rows 0..8 = conv taps for student/teacher, rest zero)
    # row_ref/col_ref: (1, HW) int32 spatial row / col index of each flattened position
    # params_ref   : (2,) f32 SMEM -> [conv_bias, temperature]
    # a_ref        : (1, 1, HW) f32 out  -> 1 - cos/T for this image
    # g_ref        : (1, 1, HW) f32 out  -> sigmoid(conv) gate for this image
    HW = H * W
    s = s_ref[0].astype(jnp.float32)          # (C, HW)
    t = t_ref[0].astype(jnp.float32)          # (C, HW)

    # ---- cosine similarity over channels (per spatial position) ----
    dot = jnp.sum(s * t, axis=0, keepdims=True)   # (1, HW)
    ss = jnp.sum(s * s, axis=0, keepdims=True)
    tt = jnp.sum(t * t, axis=0, keepdims=True)
    eps = 1e-8
    cos = dot * jax.lax.rsqrt(jnp.maximum(ss * tt, eps * eps))
    temp = params_ref[1]
    a_ref[0] = 1.0 - cos / temp                   # (1, HW)

    # ---- spatial gate: 3x3 conv (2C -> 1 channel) + sigmoid ----
    # proj[k, hw] = sum_c W[0, c, kh, kw] * s[c, hw] + sum_c W[0, C+c, kh, kw] * t[c, hw]
    # with k = 3*kh + kw  (unshifted per-tap channel projections, done on the MXU).
    proj = (jnp.dot(ws_ref[...], s, preferred_element_type=jnp.float32) +
            jnp.dot(wt_ref[...], t, preferred_element_type=jnp.float32))   # (16, HW)

    row = row_ref[...]                            # (1, HW) int32
    col = col_ref[...]
    logit = jnp.full((1, HW), params_ref[0], dtype=jnp.float32)
    k = 0
    for oh in (-1, 0, 1):
        for ow in (-1, 0, 1):
            tap = proj[k:k + 1, :]                # (1, HW)
            off = oh * W + ow                     # flattened-spatial offset of this tap
            if off != 0:
                # shifted[hw] = tap[hw + off]  (roll semantics match jnp.roll)
                tap = pltpu.roll(tap, shift=(-off) % HW, axis=1)
            valid = ((row + oh >= 0) & (row + oh < H) &
                     (col + ow >= 0) & (col + ow < W))    # zero padding of the conv
            logit = logit + jnp.where(valid, tap, 0.0)
            k += 1
    g_ref[0] = 1.0 / (1.0 + jnp.exp(-logit))      # sigmoid, (1, HW)


def spatial_gating_distillation_loss(student, teacher, conv_weight, conv_bias,
                                     temperature=1.0):
    """student, teacher: (B, C, H, W). conv_weight: (1, 2C, 3, 3). conv_bias: (1,)."""
    B, C, H, W = student.shape
    HW = H * W

    # Big tensors keep their native dtype (no f32 copy in HBM); reshape is free.
    s = student.reshape(B, C, HW)
    t = teacher.reshape(B, C, HW)

    # Conv weights -> per-tap channel-projection matrices (tiny, host/XLA side).
    w = conv_weight.astype(jnp.float32)
    w_s = jnp.transpose(w[0, :C], (1, 2, 0)).reshape(9, C)   # [3*kh+kw, c]
    w_t = jnp.transpose(w[0, C:], (1, 2, 0)).reshape(9, C)
    w_s = jnp.pad(w_s, ((0, 7), (0, 0)))                     # (16, C), sublane aligned
    w_t = jnp.pad(w_t, ((0, 7), (0, 0)))

    hw_idx = jnp.arange(HW, dtype=jnp.int32)
    row_ids = (hw_idx // W).reshape(1, HW)
    col_ids = (hw_idx % W).reshape(1, HW)

    bias_scalar = jnp.asarray(conv_bias, dtype=jnp.float32).reshape(())
    temp_scalar = jnp.asarray(temperature, dtype=jnp.float32).reshape(())
    params = jnp.stack([bias_scalar, temp_scalar])           # (2,) f32

    kernel = functools.partial(_sgd_loss_kernel, H=H, W=W)

    a_part, g_part = pl.pallas_call(
        kernel,
        out_shape=(jax.ShapeDtypeStruct((B, 1, HW), jnp.float32),
                   jax.ShapeDtypeStruct((B, 1, HW), jnp.float32)),
        grid=(B,),
        in_specs=[
            pl.BlockSpec((1, C, HW), lambda b: (b, 0, 0)),   # student image b
            pl.BlockSpec((1, C, HW), lambda b: (b, 0, 0)),   # teacher image b
            pl.BlockSpec((16, C), lambda b: (0, 0)),         # student conv taps
            pl.BlockSpec((16, C), lambda b: (0, 0)),         # teacher conv taps
            pl.BlockSpec((1, HW), lambda b: (0, 0)),         # spatial row ids
            pl.BlockSpec((1, HW), lambda b: (0, 0)),         # spatial col ids
            pl.BlockSpec(memory_space=pltpu.MemorySpace.SMEM),  # [bias, temperature]
        ],
        out_specs=(
            pl.BlockSpec((1, 1, HW), lambda b: (b, 0, 0)),   # 1 - cos/T  (lane dense)
            pl.BlockSpec((1, 1, HW), lambda b: (b, 0, 0)),   # gate       (lane dense)
        ),
        compiler_params=pltpu.CompilerParams(
            dimension_semantics=("parallel",)),
    )(s, t, w_s, w_t, row_ids, col_ids, params)

    # Tiny O(B*HW) finalize in plain JAX (keeps the grid fully parallel).
    a_sum = jnp.sum(a_part[:, 0, :], axis=0)                 # sum_b (1 - cos/T)
    g_sum = jnp.sum(g_part[:, 0, :], axis=0)                 # sum_b gate
    # Faithful to PyTorch's (B,H,W) * (B,1,H,W) -> (B,B,H,W) broadcast + .mean().
    return jnp.sum(a_sum * g_sum) / (B * B * HW)


def _reference_loss(student, teacher, conv_weight, conv_bias, temperature):
    # Pure-JAX mirror of the PyTorch forward (including the broadcast to (B,B,H,W)).
    s = student.astype(jnp.float32)
    t = teacher.astype(jnp.float32)
    x = jnp.concatenate([s, t], axis=1)
    logits = jax.lax.conv_general_dilated(
        x, conv_weight.astype(jnp.float32),
        window_strides=(1, 1), padding=((1, 1), (1, 1)),
        dimension_numbers=("NCHW", "OIHW", "NCHW"))
    logits = logits + conv_bias.astype(jnp.float32).reshape(1, 1, 1, 1)
    gate = jax.nn.sigmoid(logits)                            # (B, 1, H, W)
    dot = jnp.sum(s * t, axis=1)
    ss = jnp.sum(s * s, axis=1)
    tt = jnp.sum(t * t, axis=1)
    eps = 1e-8
    cos = dot / jnp.sqrt(jnp.maximum(ss * tt, eps * eps))    # F.cosine_similarity
    cos = cos / temperature
    loss = (1.0 - cos) * gate                                # -> (B, B, H, W)
    return jnp.mean(loss)


if __name__ == "__main__":
    B, C, H, W = 2, 4, 16, 16
    key = jax.random.PRNGKey(0)
    k1, k2, k3, k4 = jax.random.split(key, 4)

    def _bf16_exact(x):
        # Keep test data exactly bf16-representable so the MXU projection matches
        # the f32 reference bit-for-bit regardless of the default matmul precision.
        return x.astype(jnp.bfloat16).astype(jnp.float32)

    student = _bf16_exact(jax.random.normal(k1, (B, C, H, W), dtype=jnp.float32))
    teacher = _bf16_exact(jax.random.normal(k2, (B, C, H, W), dtype=jnp.float32))
    conv_weight = _bf16_exact(
        jax.random.normal(k3, (1, 2 * C, 3, 3), dtype=jnp.float32) * 0.1)
    conv_bias = _bf16_exact(jax.random.normal(k4, (1,), dtype=jnp.float32) * 0.1)
    temperature = 0.5

    loss = spatial_gating_distillation_loss(
        student, teacher, conv_weight, conv_bias, temperature)
    loss = jax.block_until_ready(loss)

    ref = _reference_loss(student, teacher, conv_weight, conv_bias, temperature)
    assert jnp.allclose(loss, ref, atol=1e-4, rtol=1e-4), (loss, ref)

    print("KERNEL_OK")
</pallas_src>

<mosaic_0001>
module attributes {stable_mosaic.version = 11 : i64} {
  func.func @_sgd_loss_kernel(%arg0: i32, %arg1: memref<1x4x256xf32, #tpu.memory_space<vmem>>, %arg2: memref<1x4x256xf32, #tpu.memory_space<vmem>>, %arg3: memref<16x4xf32, #tpu.memory_space<vmem>>, %arg4: memref<16x4xf32, #tpu.memory_space<vmem>>, %arg5: memref<1x256xi32, #tpu.memory_space<vmem>>, %arg6: memref<1x256xi32, #tpu.memory_space<vmem>>, %arg7: memref<2xf32, #tpu.memory_space<smem>>, %arg8: memref<1x1x256xf32, #tpu.memory_space<vmem>>, %arg9: memref<1x1x256xf32, #tpu.memory_space<vmem>>) attributes {dimension_semantics = [#tpu.dimension_semantics<parallel>], iteration_bounds = array<i64: 2>, scalar_prefetch = 0 : i64, scratch_operands = 0 : i64, tpu.core_type = #tpu.core_type<tc>, window_params = [{transform_indices = @transform_0, window_bounds = array<i64: 1, 4, 256>}, {transform_indices = @transform_1, window_bounds = array<i64: 1, 4, 256>}, {pipeline_mode = #tpu.pipeline_mode<synchronous>, transform_indices = @transform_2, window_bounds = array<i64: 16, 4>}, {pipeline_mode = #tpu.pipeline_mode<synchronous>, transform_indices = @transform_3, window_bounds = array<i64: 16, 4>}, {pipeline_mode = #tpu.pipeline_mode<synchronous>, transform_indices = @transform_4, window_bounds = array<i64: 1, 256>}, {pipeline_mode = #tpu.pipeline_mode<synchronous>, transform_indices = @transform_5, window_bounds = array<i64: 1, 256>}, {transform_indices = @transform_6, window_bounds = array<i64: 2>}, {transform_indices = @transform_7, window_bounds = array<i64: 1, 1, 256>}, {transform_indices = @transform_8, window_bounds = array<i64: 1, 1, 256>}]} {
    %c0 = arith.constant 0 : index
    %c0_0 = arith.constant 0 : index
    %c0_1 = arith.constant 0 : index
    %0 = vector.load %arg1[%c0, %c0_0, %c0_1] : memref<1x4x256xf32, #tpu.memory_space<vmem>>, vector<1x4x256xf32>
    %1 = vector.shape_cast %0 : vector<1x4x256xf32> to vector<4x256xf32>
    %c0_2 = arith.constant 0 : index
    %c0_3 = arith.constant 0 : index
    %c0_4 = arith.constant 0 : index
    %2 = vector.load %arg2[%c0_2, %c0_3, %c0_4] : memref<1x4x256xf32, #tpu.memory_space<vmem>>, vector<1x4x256xf32>
    %3 = vector.shape_cast %2 : vector<1x4x256xf32> to vector<4x256xf32>
    %4 = arith.mulf %1, %3 : vector<4x256xf32>
    %cst = arith.constant dense<0.000000e+00> : vector<256xf32>
    %5 = vector.multi_reduction <add>, %4, %cst [0] : vector<4x256xf32> to vector<256xf32>
    %6 = vector.shape_cast %5 : vector<256xf32> to vector<1x256xf32>
    %7 = arith.mulf %1, %1 : vector<4x256xf32>
    %cst_5 = arith.constant dense<0.000000e+00> : vector<256xf32>
    %8 = vector.multi_reduction <add>, %7, %cst_5 [0] : vector<4x256xf32> to vector<256xf32>
    %9 = vector.shape_cast %8 : vector<256xf32> to vector<1x256xf32>
    %10 = arith.mulf %3, %3 : vector<4x256xf32>
    %cst_6 = arith.constant dense<0.000000e+00> : vector<256xf32>
    %11 = vector.multi_reduction <add>, %10, %cst_6 [0] : vector<4x256xf32> to vector<256xf32>
    %12 = vector.shape_cast %11 : vector<256xf32> to vector<1x256xf32>
    %13 = arith.mulf %9, %12 : vector<1x256xf32>
    %cst_7 = arith.constant 1.000000e-16 : f32
    %14 = vector.broadcast %cst_7 : f32 to vector<1x256xf32>
    %15 = arith.maximumf %13, %14 : vector<1x256xf32>
    %16 = math.rsqrt %15 : vector<1x256xf32>
    %17 = arith.mulf %6, %16 : vector<1x256xf32>
    %c1 = arith.constant 1 : index
    %18 = memref.load %arg7[%c1] : memref<2xf32, #tpu.memory_space<smem>>
    %19 = vector.broadcast %18 : f32 to vector<1x256xf32>
    %20 = arith.divf %17, %19 : vector<1x256xf32>
    %cst_8 = arith.constant 1.000000e+00 : f32
    %21 = vector.broadcast %cst_8 : f32 to vector<1x256xf32>
    %22 = arith.subf %21, %20 : vector<1x256xf32>
    %c0_9 = arith.constant 0 : index
    %c0_10 = arith.constant 0 : index
    %c0_11 = arith.constant 0 : index
    %23 = vector.load %arg8[%c0_9, %c0_10, %c0_11] : memref<1x1x256xf32, #tpu.memory_space<vmem>>, vector<1x1x256xf32>
    %24 = vector.shape_cast %23 : vector<1x1x256xf32> to vector<1x256xf32>
    %25 = vector.shape_cast %22 : vector<1x256xf32> to vector<1x1x256xf32>
    tpu.vector_store %arg8[%c0_9, %c0_10, %c0_11], %25 {strides = array<i32>} : memref<1x1x256xf32, #tpu.memory_space<vmem>>, vector<1x1x256xf32>,
    %c0_12 = arith.constant 0 : index
    %c0_13 = arith.constant 0 : index
    %26 = vector.load %arg3[%c0_12, %c0_13] : memref<16x4xf32, #tpu.memory_space<vmem>>, vector<16x4xf32>
    %cst_14 = arith.constant dense<0.000000e+00> : vector<16x256xf32>
    %27 = tpu.matmul %26, %1, %cst_14 {dimension_numbers = #tpu.dot_dimension_numbers<[1], [0], [0], [1], [0, 0, 1, 1], [], []>} : vector<16x4xf32>, vector<4x256xf32>, vector<16x256xf32> -> vector<16x256xf32>
    %c0_15 = arith.constant 0 : index
    %c0_16 = arith.constant 0 : index
    %28 = vector.load %arg4[%c0_15, %c0_16] : memref<16x4xf32, #tpu.memory_space<vmem>>, vector<16x4xf32>
    %cst_17 = arith.constant dense<0.000000e+00> : vector<16x256xf32>
    %29 = tpu.matmul %28, %3, %cst_17 {dimension_numbers = #tpu.dot_dimension_numbers<[1], [0], [0], [1], [0, 0, 1, 1], [], []>} : vector<16x4xf32>, vector<4x256xf32>, vector<16x256xf32> -> vector<16x256xf32>
    %30 = arith.addf %27, %29 : vector<16x256xf32>
    %c0_18 = arith.constant 0 : index
    %c0_19 = arith.constant 0 : index
    %31 = vector.load %arg5[%c0_18, %c0_19] : memref<1x256xi32, #tpu.memory_space<vmem>>, vector<1x256xi32>
    %c0_20 = arith.constant 0 : index
    %c0_21 = arith.constant 0 : index
    %32 = vector.load %arg6[%c0_20, %c0_21] : memref<1x256xi32, #tpu.memory_space<vmem>>, vector<1x256xi32>
    %c0_22 = arith.constant 0 : index
    %33 = memref.load %arg7[%c0_22] : memref<2xf32, #tpu.memory_space<smem>>
    %34 = vector.broadcast %33 : f32 to vector<1x256xf32>
    %35 = vector.extract_strided_slice %30 {offsets = [0, 0], sizes = [1, 256], strides = [1, 1]} : vector<16x256xf32> to vector<1x256xf32>
    %c17_i32 = arith.constant 17 : i32
    %36 = tpu.dynamic_rotate %35 by %c17_i32 dim 1 : vector<1x256xf32>, i32 -> vector<1x256xf32>
    %c-1_i32 = arith.constant -1 : i32
    %37 = vector.broadcast %c-1_i32 : i32 to vector<1x256xi32>
    %38 = arith.addi %31, %37 : vector<1x256xi32>
    %c0_i32 = arith.constant 0 : i32
    %39 = vector.broadcast %c0_i32 : i32 to vector<1x256xi32>
    %40 = arith.cmpi sge, %38, %39 : vector<1x256xi32>
    %c-1_i32_23 = arith.constant -1 : i32
    %41 = vector.broadcast %c-1_i32_23 : i32 to vector<1x256xi32>
    %42 = arith.addi %31, %41 : vector<1x256xi32>
    %c16_i32 = arith.constant 16 : i32
    %43 = vector.broadcast %c16_i32 : i32 to vector<1x256xi32>
    %44 = arith.cmpi slt, %42, %43 : vector<1x256xi32>
    %45 = arith.andi %40, %44 : vector<1x256xi1>
    %c-1_i32_24 = arith.constant -1 : i32
    %46 = vector.broadcast %c-1_i32_24 : i32 to vector<1x256xi32>
    %47 = arith.addi %32, %46 : vector<1x256xi32>
    %c0_i32_25 = arith.constant 0 : i32
    %48 = vector.broadcast %c0_i32_25 : i32 to vector<1x256xi32>
    %49 = arith.cmpi sge, %47, %48 : vector<1x256xi32>
    %50 = arith.andi %45, %49 : vector<1x256xi1>
    %c-1_i32_26 = arith.constant -1 : i32
    %51 = vector.broadcast %c-1_i32_26 : i32 to vector<1x256xi32>
    %52 = arith.addi %32, %51 : vector<1x256xi32>
    %c16_i32_27 = arith.constant 16 : i32
    %53 = vector.broadcast %c16_i32_27 : i32 to vector<1x256xi32>
    %54 = arith.cmpi slt, %52, %53 : vector<1x256xi32>
    %55 = arith.andi %50, %54 : vector<1x256xi1>
    %cst_28 = arith.constant 0.000000e+00 : f32
    %56 = vector.broadcast %cst_28 : f32 to vector<1x256xf32>
    %57 = arith.select %55, %36, %56 : vector<1x256xi1>, vector<1x256xf32>
    %58 = arith.addf %34, %57 : vector<1x256xf32>
    %59 = vector.extract_strided_slice %30 {offsets = [1, 0], sizes = [1, 256], strides = [1, 1]} : vector<16x256xf32> to vector<1x256xf32>
    %c16_i32_29 = arith.constant 16 : i32
    %60 = tpu.dynamic_rotate %59 by %c16_i32_29 dim 1 : vector<1x256xf32>, i32 -> vector<1x256xf32>
    %c-1_i32_30 = arith.constant -1 : i32
    %61 = vector.broadcast %c-1_i32_30 : i32 to vector<1x256xi32>
    %62 = arith.addi %31, %61 : vector<1x256xi32>
    %c0_i32_31 = arith.constant 0 : i32
    %63 = vector.broadcast %c0_i32_31 : i32 to vector<1x256xi32>
    %64 = arith.cmpi sge, %62, %63 : vector<1x256xi32>
    %c-1_i32_32 = arith.constant -1 : i32
    %65 = vector.broadcast %c-1_i32_32 : i32 to vector<1x256xi32>
    %66 = arith.addi %31, %65 : vector<1x256xi32>
    %c16_i32_33 = arith.constant 16 : i32
    %67 = vector.broadcast %c16_i32_33 : i32 to vector<1x256xi32>
    %68 = arith.cmpi slt, %66, %67 : vector<1x256xi32>
    %69 = arith.andi %64, %68 : vector<1x256xi1>
    %c0_i32_34 = arith.constant 0 : i32
    %70 = vector.broadcast %c0_i32_34 : i32 to vector<1x256xi32>
    %71 = arith.addi %32, %70 : vector<1x256xi32>
    %c0_i32_35 = arith.constant 0 : i32
    %72 = vector.broadcast %c0_i32_35 : i32 to vector<1x256xi32>
    %73 = arith.cmpi sge, %71, %72 : vector<1x256xi32>
    %74 = arith.andi %69, %73 : vector<1x256xi1>
    %c0_i32_36 = arith.constant 0 : i32
    %75 = vector.broadcast %c0_i32_36 : i32 to vector<1x256xi32>
    %76 = arith.addi %32, %75 : vector<1x256xi32>
    %c16_i32_37 = arith.constant 16 : i32
    %77 = vector.broadcast %c16_i32_37 : i32 to vector<1x256xi32>
    %78 = arith.cmpi slt, %76, %77 : vector<1x256xi32>
    %79 = arith.andi %74, %78 : vector<1x256xi1>
    %cst_38 = arith.constant 0.000000e+00 : f32
    %80 = vector.broadcast %cst_38 : f32 to vector<1x256xf32>
    %81 = arith.select %79, %60, %80 : vector<1x256xi1>, vector<1x256xf32>
    %82 = arith.addf %58, %81 : vector<1x256xf32>
    %83 = vector.extract_strided_slice %30 {offsets = [2, 0], sizes = [1, 256], strides = [1, 1]} : vector<16x256xf32> to vector<1x256xf32>
    %c15_i32 = arith.constant 15 : i32
    %84 = tpu.dynamic_rotate %83 by %c15_i32 dim 1 : vector<1x256xf32>, i32 -> vector<1x256xf32>
    %c-1_i32_39 = arith.constant -1 : i32
    %85 = vector.broadcast %c-1_i32_39 : i32 to vector<1x256xi32>
    %86 = arith.addi %31, %85 : vector<1x256xi32>
    %c0_i32_40 = arith.constant 0 : i32
    %87 = vector.broadcast %c0_i32_40 : i32 to vector<1x256xi32>
    %88 = arith.cmpi sge, %86, %87 : vector<1x256xi32>
    %c-1_i32_41 = arith.constant -1 : i32
    %89 = vector.broadcast %c-1_i32_41 : i32 to vector<1x256xi32>
    %90 = arith.addi %31, %89 : vector<1x256xi32>
    %c16_i32_42 = arith.constant 16 : i32
    %91 = vector.broadcast %c16_i32_42 : i32 to vector<1x256xi32>
    %92 = arith.cmpi slt, %90, %91 : vector<1x256xi32>
    %93 = arith.andi %88, %92 : vector<1x256xi1>
    %c1_i32 = arith.constant 1 : i32
    %94 = vector.broadcast %c1_i32 : i32 to vector<1x256xi32>
    %95 = arith.addi %32, %94 : vector<1x256xi32>
    %c0_i32_43 = arith.constant 0 : i32
    %96 = vector.broadcast %c0_i32_43 : i32 to vector<1x256xi32>
    %97 = arith.cmpi sge, %95, %96 : vector<1x256xi32>
    %98 = arith.andi %93, %97 : vector<1x256xi1>
    %c1_i32_44 = arith.constant 1 : i32
    %99 = vector.broadcast %c1_i32_44 : i32 to vector<1x256xi32>
    %100 = arith.addi %32, %99 : vector<1x256xi32>
    %c16_i32_45 = arith.constant 16 : i32
    %101 = vector.broadcast %c16_i32_45 : i32 to vector<1x256xi32>
    %102 = arith.cmpi slt, %100, %101 : vector<1x256xi32>
    %103 = arith.andi %98, %102 : vector<1x256xi1>
    %cst_46 = arith.constant 0.000000e+00 : f32
    %104 = vector.broadcast %cst_46 : f32 to vector<1x256xf32>
    %105 = arith.select %103, %84, %104 : vector<1x256xi1>, vector<1x256xf32>
    %106 = arith.addf %82, %105 : vector<1x256xf32>
    %107 = vector.extract_strided_slice %30 {offsets = [3, 0], sizes = [1, 256], strides = [1, 1]} : vector<16x256xf32> to vector<1x256xf32>
    %c1_i32_47 = arith.constant 1 : i32
    %108 = tpu.dynamic_rotate %107 by %c1_i32_47 dim 1 : vector<1x256xf32>, i32 -> vector<1x256xf32>
    %c0_i32_48 = arith.constant 0 : i32
    %109 = vector.broadcast %c0_i32_48 : i32 to vector<1x256xi32>
    %110 = arith.addi %31, %109 : vector<1x256xi32>
    %c0_i32_49 = arith.constant 0 : i32
    %111 = vector.broadcast %c0_i32_49 : i32 to vector<1x256xi32>
    %112 = arith.cmpi sge, %110, %111 : vector<1x256xi32>
    %c0_i32_50 = arith.constant 0 : i32
    %113 = vector.broadcast %c0_i32_50 : i32 to vector<1x256xi32>
    %114 = arith.addi %31, %113 : vector<1x256xi32>
    %c16_i32_51 = arith.constant 16 : i32
    %115 = vector.broadcast %c16_i32_51 : i32 to vector<1x256xi32>
    %116 = arith.cmpi slt, %114, %115 : vector<1x256xi32>
    %117 = arith.andi %112, %116 : vector<1x256xi1>
    %c-1_i32_52 = arith.constant -1 : i32
    %118 = vector.broadcast %c-1_i32_52 : i32 to vector<1x256xi32>
    %119 = arith.addi %32, %118 : vector<1x256xi32>
    %c0_i32_53 = arith.constant 0 : i32
    %120 = vector.broadcast %c0_i32_53 : i32 to vector<1x256xi32>
    %121 = arith.cmpi sge, %119, %120 : vector<1x256xi32>
    %122 = arith.andi %117, %121 : vector<1x256xi1>
    %c-1_i32_54 = arith.constant -1 : i32
    %123 = vector.broadcast %c-1_i32_54 : i32 to vector<1x256xi32>
    %124 = arith.addi %32, %123 : vector<1x256xi32>
    %c16_i32_55 = arith.constant 16 : i32
    %125 = vector.broadcast %c16_i32_55 : i32 to vector<1x256xi32>
    %126 = arith.cmpi slt, %124, %125 : vector<1x256xi32>
    %127 = arith.andi %122, %126 : vector<1x256xi1>
    %cst_56 = arith.constant 0.000000e+00 : f32
    %128 = vector.broadcast %cst_56 : f32 to vector<1x256xf32>
    %129 = arith.select %127, %108, %128 : vector<1x256xi1>, vector<1x256xf32>
    %130 = arith.addf %106, %129 : vector<1x256xf32>
    %131 = vector.extract_strided_slice %30 {offsets = [4, 0], sizes = [1, 256], strides = [1, 1]} : vector<16x256xf32> to vector<1x256xf32>
    %c0_i32_57 = arith.constant 0 : i32
    %132 = vector.broadcast %c0_i32_57 : i32 to vector<1x256xi32>
    %133 = arith.addi %31, %132 : vector<1x256xi32>
    %c0_i32_58 = arith.constant 0 : i32
    %134 = vector.broadcast %c0_i32_58 : i32 to vector<1x256xi32>
    %135 = arith.cmpi sge, %133, %134 : vector<1x256xi32>
    %c0_i32_59 = arith.constant 0 : i32
    %136 = vector.broadcast %c0_i32_59 : i32 to vector<1x256xi32>
    %137 = arith.addi %31, %136 : vector<1x256xi32>
    %c16_i32_60 = arith.constant 16 : i32
    %138 = vector.broadcast %c16_i32_60 : i32 to vector<1x256xi32>
    %139 = arith.cmpi slt, %137, %138 : vector<1x256xi32>
    %140 = arith.andi %135, %139 : vector<1x256xi1>
    %c0_i32_61 = arith.constant 0 : i32
    %141 = vector.broadcast %c0_i32_61 : i32 to vector<1x256xi32>
    %142 = arith.addi %32, %141 : vector<1x256xi32>
    %c0_i32_62 = arith.constant 0 : i32
    %143 = vector.broadcast %c0_i32_62 : i32 to vector<1x256xi32>
    %144 = arith.cmpi sge, %142, %143 : vector<1x256xi32>
    %145 = arith.andi %140, %144 : vector<1x256xi1>
    %c0_i32_63 = arith.constant 0 : i32
    %146 = vector.broadcast %c0_i32_63 : i32 to vector<1x256xi32>
    %147 = arith.addi %32, %146 : vector<1x256xi32>
    %c16_i32_64 = arith.constant 16 : i32
    %148 = vector.broadcast %c16_i32_64 : i32 to vector<1x256xi32>
    %149 = arith.cmpi slt, %147, %148 : vector<1x256xi32>
    %150 = arith.andi %145, %149 : vector<1x256xi1>
    %cst_65 = arith.constant 0.000000e+00 : f32
    %151 = vector.broadcast %cst_65 : f32 to vector<1x256xf32>
    %152 = arith.select %150, %131, %151 : vector<1x256xi1>, vector<1x256xf32>
    %153 = arith.addf %130, %152 : vector<1x256xf32>
    %154 = vector.extract_strided_slice %30 {offsets = [5, 0], sizes = [1, 256], strides = [1, 1]} : vector<16x256xf32> to vector<1x256xf32>
    %c255_i32 = arith.constant 255 : i32
    %155 = tpu.dynamic_rotate %154 by %c255_i32 dim 1 : vector<1x256xf32>, i32 -> vector<1x256xf32>
    %c0_i32_66 = arith.constant 0 : i32
    %156 = vector.broadcast %c0_i32_66 : i32 to vector<1x256xi32>
    %157 = arith.addi %31, %156 : vector<1x256xi32>
    %c0_i32_67 = arith.constant 0 : i32
    %158 = vector.broadcast %c0_i32_67 : i32 to vector<1x256xi32>
    %159 = arith.cmpi sge, %157, %158 : vector<1x256xi32>
    %c0_i32_68 = arith.constant 0 : i32
    %160 = vector.broadcast %c0_i32_68 : i32 to vector<1x256xi32>
    %161 = arith.addi %31, %160 : vector<1x256xi32>
    %c16_i32_69 = arith.constant 16 : i32
    %162 = vector.broadcast %c16_i32_69 : i32 to vector<1x256xi32>
    %163 = arith.cmpi slt, %161, %162 : vector<1x256xi32>
    %164 = arith.andi %159, %163 : vector<1x256xi1>
    %c1_i32_70 = arith.constant 1 : i32
    %165 = vector.broadcast %c1_i32_70 : i32 to vector<1x256xi32>
    %166 = arith.addi %32, %165 : vector<1x256xi32>
    %c0_i32_71 = arith.constant 0 : i32
    %167 = vector.broadcast %c0_i32_71 : i32 to vector<1x256xi32>
    %168 = arith.cmpi sge, %166, %167 : vector<1x256xi32>
    %169 = arith.andi %164, %168 : vector<1x256xi1>
    %c1_i32_72 = arith.constant 1 : i32
    %170 = vector.broadcast %c1_i32_72 : i32 to vector<1x256xi32>
    %171 = arith.addi %32, %170 : vector<1x256xi32>
    %c16_i32_73 = arith.constant 16 : i32
    %172 = vector.broadcast %c16_i32_73 : i32 to vector<1x256xi32>
    %173 = arith.cmpi slt, %171, %172 : vector<1x256xi32>
    %174 = arith.andi %169, %173 : vector<1x256xi1>
    %cst_74 = arith.constant 0.000000e+00 : f32
    %175 = vector.broadcast %cst_74 : f32 to vector<1x256xf32>
    %176 = arith.select %174, %155, %175 : vector<1x256xi1>, vector<1x256xf32>
    %177 = arith.addf %153, %176 : vector<1x256xf32>
    %178 = vector.extract_strided_slice %30 {offsets = [6, 0], sizes = [1, 256], strides = [1, 1]} : vector<16x256xf32> to vector<1x256xf32>
    %c241_i32 = arith.constant 241 : i32
    %179 = tpu.dynamic_rotate %178 by %c241_i32 dim 1 : vector<1x256xf32>, i32 -> vector<1x256xf32>
    %c1_i32_75 = arith.constant 1 : i32
    %180 = vector.broadcast %c1_i32_75 : i32 to vector<1x256xi32>
    %181 = arith.addi %31, %180 : vector<1x256xi32>
    %c0_i32_76 = arith.constant 0 : i32
    %182 = vector.broadcast %c0_i32_76 : i32 to vector<1x256xi32>
    %183 = arith.cmpi sge, %181, %182 : vector<1x256xi32>
    %c1_i32_77 = arith.constant 1 : i32
    %184 = vector.broadcast %c1_i32_77 : i32 to vector<1x256xi32>
    %185 = arith.addi %31, %184 : vector<1x256xi32>
    %c16_i32_78 = arith.constant 16 : i32
    %186 = vector.broadcast %c16_i32_78 : i32 to vector<1x256xi32>
    %187 = arith.cmpi slt, %185, %186 : vector<1x256xi32>
    %188 = arith.andi %183, %187 : vector<1x256xi1>
    %c-1_i32_79 = arith.constant -1 : i32
    %189 = vector.broadcast %c-1_i32_79 : i32 to vector<1x256xi32>
    %190 = arith.addi %32, %189 : vector<1x256xi32>
    %c0_i32_80 = arith.constant 0 : i32
    %191 = vector.broadcast %c0_i32_80 : i32 to vector<1x256xi32>
    %192 = arith.cmpi sge, %190, %191 : vector<1x256xi32>
    %193 = arith.andi %188, %192 : vector<1x256xi1>
    %c-1_i32_81 = arith.constant -1 : i32
    %194 = vector.broadcast %c-1_i32_81 : i32 to vector<1x256xi32>
    %195 = arith.addi %32, %194 : vector<1x256xi32>
    %c16_i32_82 = arith.constant 16 : i32
    %196 = vector.broadcast %c16_i32_82 : i32 to vector<1x256xi32>
    %197 = arith.cmpi slt, %195, %196 : vector<1x256xi32>
    %198 = arith.andi %193, %197 : vector<1x256xi1>
    %cst_83 = arith.constant 0.000000e+00 : f32
    %199 = vector.broadcast %cst_83 : f32 to vector<1x256xf32>
    %200 = arith.select %198, %179, %199 : vector<1x256xi1>, vector<1x256xf32>
    %201 = arith.addf %177, %200 : vector<1x256xf32>
    %202 = vector.extract_strided_slice %30 {offsets = [7, 0], sizes = [1, 256], strides = [1, 1]} : vector<16x256xf32> to vector<1x256xf32>
    %c240_i32 = arith.constant 240 : i32
    %203 = tpu.dynamic_rotate %202 by %c240_i32 dim 1 : vector<1x256xf32>, i32 -> vector<1x256xf32>
    %c1_i32_84 = arith.constant 1 : i32
    %204 = vector.broadcast %c1_i32_84 : i32 to vector<1x256xi32>
    %205 = arith.addi %31, %204 : vector<1x256xi32>
    %c0_i32_85 = arith.constant 0 : i32
    %206 = vector.broadcast %c0_i32_85 : i32 to vector<1x256xi32>
    %207 = arith.cmpi sge, %205, %206 : vector<1x256xi32>
    %c1_i32_86 = arith.constant 1 : i32
    %208 = vector.broadcast %c1_i32_86 : i32 to vector<1x256xi32>
    %209 = arith.addi %31, %208 : vector<1x256xi32>
    %c16_i32_87 = arith.constant 16 : i32
    %210 = vector.broadcast %c16_i32_87 : i32 to vector<1x256xi32>
    %211 = arith.cmpi slt, %209, %210 : vector<1x256xi32>
    %212 = arith.andi %207, %211 : vector<1x256xi1>
    %c0_i32_88 = arith.constant 0 : i32
    %213 = vector.broadcast %c0_i32_88 : i32 to vector<1x256xi32>
    %214 = arith.addi %32, %213 : vector<1x256xi32>
    %c0_i32_89 = arith.constant 0 : i32
    %215 = vector.broadcast %c0_i32_89 : i32 to vector<1x256xi32>
    %216 = arith.cmpi sge, %214, %215 : vector<1x256xi32>
    %217 = arith.andi %212, %216 : vector<1x256xi1>
    %c0_i32_90 = arith.constant 0 : i32
    %218 = vector.broadcast %c0_i32_90 : i32 to vector<1x256xi32>
    %219 = arith.addi %32, %218 : vector<1x256xi32>
    %c16_i32_91 = arith.constant 16 : i32
    %220 = vector.broadcast %c16_i32_91 : i32 to vector<1x256xi32>
    %221 = arith.cmpi slt, %219, %220 : vector<1x256xi32>
    %222 = arith.andi %217, %221 : vector<1x256xi1>
    %cst_92 = arith.constant 0.000000e+00 : f32
    %223 = vector.broadcast %cst_92 : f32 to vector<1x256xf32>
    %224 = arith.select %222, %203, %223 : vector<1x256xi1>, vector<1x256xf32>
    %225 = arith.addf %201, %224 : vector<1x256xf32>
    %226 = vector.extract_strided_slice %30 {offsets = [8, 0], sizes = [1, 256], strides = [1, 1]} : vector<16x256xf32> to vector<1x256xf32>
    %c239_i32 = arith.constant 239 : i32
    %227 = tpu.dynamic_rotate %226 by %c239_i32 dim 1 : vector<1x256xf32>, i32 -> vector<1x256xf32>
    %c1_i32_93 = arith.constant 1 : i32
    %228 = vector.broadcast %c1_i32_93 : i32 to vector<1x256xi32>
    %229 = arith.addi %31, %228 : vector<1x256xi32>
    %c0_i32_94 = arith.constant 0 : i32
    %230 = vector.broadcast %c0_i32_94 : i32 to vector<1x256xi32>
    %231 = arith.cmpi sge, %229, %230 : vector<1x256xi32>
    %c1_i32_95 = arith.constant 1 : i32
    %232 = vector.broadcast %c1_i32_95 : i32 to vector<1x256xi32>
    %233 = arith.addi %31, %232 : vector<1x256xi32>
    %c16_i32_96 = arith.constant 16 : i32
    %234 = vector.broadcast %c16_i32_96 : i32 to vector<1x256xi32>
    %235 = arith.cmpi slt, %233, %234 : vector<1x256xi32>
    %236 = arith.andi %231, %235 : vector<1x256xi1>
    %c1_i32_97 = arith.constant 1 : i32
    %237 = vector.broadcast %c1_i32_97 : i32 to vector<1x256xi32>
    %238 = arith.addi %32, %237 : vector<1x256xi32>
    %c0_i32_98 = arith.constant 0 : i32
    %239 = vector.broadcast %c0_i32_98 : i32 to vector<1x256xi32>
    %240 = arith.cmpi sge, %238, %239 : vector<1x256xi32>
    %241 = arith.andi %236, %240 : vector<1x256xi1>
    %c1_i32_99 = arith.constant 1 : i32
    %242 = vector.broadcast %c1_i32_99 : i32 to vector<1x256xi32>
    %243 = arith.addi %32, %242 : vector<1x256xi32>
    %c16_i32_100 = arith.constant 16 : i32
    %244 = vector.broadcast %c16_i32_100 : i32 to vector<1x256xi32>
    %245 = arith.cmpi slt, %243, %244 : vector<1x256xi32>
    %246 = arith.andi %241, %245 : vector<1x256xi1>
    %cst_101 = arith.constant 0.000000e+00 : f32
    %247 = vector.broadcast %cst_101 : f32 to vector<1x256xf32>
    %248 = arith.select %246, %227, %247 : vector<1x256xi1>, vector<1x256xf32>
    %249 = arith.addf %225, %248 : vector<1x256xf32>
    %cst_102 = arith.constant 0.000000e+00 : f32
    %250 = vector.broadcast %cst_102 : f32 to vector<1x256xf32>
    %251 = arith.subf %250, %249 : vector<1x256xf32>
    %252 = math.exp %251 : vector<1x256xf32>
    %cst_103 = arith.constant 1.000000e+00 : f32
    %253 = vector.broadcast %cst_103 : f32 to vector<1x256xf32>
    %254 = arith.addf %253, %252 : vector<1x256xf32>
    %cst_104 = arith.constant 1.000000e+00 : f32
    %255 = vector.broadcast %cst_104 : f32 to vector<1x256xf32>
    %256 = arith.divf %255, %254 : vector<1x256xf32>
    %c0_105 = arith.constant 0 : index
    %c0_106 = arith.constant 0 : index
    %c0_107 = arith.constant 0 : index
    %257 = vector.load %arg9[%c0_105, %c0_106, %c0_107] : memref<1x1x256xf32, #tpu.memory_space<vmem>>, vector<1x1x256xf32>
    %258 = vector.shape_cast %257 : vector<1x1x256xf32> to vector<1x256xf32>
    %259 = vector.shape_cast %256 : vector<1x256xf32> to vector<1x1x256xf32>
    tpu.vector_store %arg9[%c0_105, %c0_106, %c0_107], %259 {strides = array<i32>} : memref<1x1x256xf32, #tpu.memory_space<vmem>>, vector<1x1x256xf32>,
    return
  }
  func.func @transform_0(%arg0: i32) -> (i32, i32, i32) {
    %c0_i32 = arith.constant 0 : i32
    %c0_i32_0 = arith.constant 0 : i32
    %c0_i32_1 = arith.constant 0 : i32
    return %arg0, %c0_i32, %c0_i32_0 : i32, i32, i32
  }
  func.func @transform_1(%arg0: i32) -> (i32, i32, i32) {
    %c0_i32 = arith.constant 0 : i32
    %c0_i32_0 = arith.constant 0 : i32
    %c0_i32_1 = arith.constant 0 : i32
    return %arg0, %c0_i32, %c0_i32_0 : i32, i32, i32
  }
  func.func @transform_2(%arg0: i32) -> (i32, i32) {
    %c0_i32 = arith.constant 0 : i32
    %c0_i32_0 = arith.constant 0 : i32
    %c0_i32_1 = arith.constant 0 : i32
    return %c0_i32, %c0_i32_0 : i32, i32
  }
  func.func @transform_3(%arg0: i32) -> (i32, i32) {
    %c0_i32 = arith.constant 0 : i32
    %c0_i32_0 = arith.constant 0 : i32
    %c0_i32_1 = arith.constant 0 : i32
    return %c0_i32, %c0_i32_0 : i32, i32
  }
  func.func @transform_4(%arg0: i32) -> (i32, i32) {
    %c0_i32 = arith.constant 0 : i32
    %c0_i32_0 = arith.constant 0 : i32
    %c0_i32_1 = arith.constant 0 : i32
    return %c0_i32, %c0_i32_0 : i32, i32
  }
  func.func @transform_5(%arg0: i32) -> (i32, i32) {
    %c0_i32 = arith.constant 0 : i32
    %c0_i32_0 = arith.constant 0 : i32
    %c0_i32_1 = arith.constant 0 : i32
    return %c0_i32, %c0_i32_0 : i32, i32
  }
  func.func @transform_6(%arg0: i32) -> i32 {
    %c0_i32 = arith.constant 0 : i32
    %c0_i32_0 = arith.constant 0 : i32
    return %c0_i32 : i32
  }
  func.func @transform_7(%arg0: i32) -> (i32, i32, i32) {
    %c0_i32 = arith.constant 0 : i32
    %c0_i32_0 = arith.constant 0 : i32
    %c0_i32_1 = arith.constant 0 : i32
    return %arg0, %c0_i32, %c0_i32_0 : i32, i32, i32
  }
  func.func @transform_8(%arg0: i32) -> (i32, i32, i32) {
    %c0_i32 = arith.constant 0 : i32
    %c0_i32_0 = arith.constant 0 : i32
    %c0_i32_1 = arith.constant 0 : i32
    return %arg0, %c0_i32, %c0_i32_0 : i32, i32, i32
  }
}

</mosaic_0001>

<bundles_post_ra>
// kernel: tpu_custom_call.1
= control target key start
LH: loop header
LB: loop body
LE: loop exit
PB: predicated region body
PF: predicated region fallthrough
CT: control target
= control target key end

     0   :  { %s1693_s0 = inlined_call_operand.vmem [shape: f32[2,4,256], index: 0, kind: input, shape index: {}]   ;;  %s1694_s1 = inlined_call_operand.vmem [shape: f32[2,4,256], index: 1, kind: input, shape index: {}]   ;;  %s1695_s2 = inlined_call_operand.vmem [shape: f32[16,4], index: 2, kind: input, shape index: {}]   ;;  %s1696_s3 = inlined_call_operand.vmem [shape: f32[16,4], index: 3, kind: input, shape index: {}]   ;;  %s1697_s4 = inlined_call_operand.vmem [shape: s32[1,256], index: 4, kind: input, shape index: {}]   ;;  %s1698_s5 = inlined_call_operand.vmem [shape: s32[1,256], index: 5, kind: input, shape index: {}]   ;;  %s1699_s6 = inlined_call_operand.vmem [shape: f32[2], index: 6, kind: input, shape index: {}]   ;;  %s1700_s7 = inlined_call_operand.hbm [shape: f32[2,1,256], index: 7, kind: output, shape index: {0}]   ;;  %s1701_s8 = inlined_call_operand.hbm [shape: f32[2,1,256], index: 8, kind: output, shape index: {1}]  }
   0x1   :  { %1704 = sst [smem:[#allocation11_spill]] %s1693_s0 }
   0x2   :  { %14 = vsyncpa [#allocation4], 0 }
   0x3   :  { %15 = vsyncpa [#allocation3], 0 }
   0x4   :  { %17 = vsyncpa [#allocation3 + $0x1], 0 }
   0x5   :  { %18 = vsyncpa [#allocation7], 0 }
   0x6   :  { %20 = vsyncpa [#allocation7 + $0x1], 0  ;;  %s1365_s27 = smov 0   ;;  %s1367_s28 = smov 0  }
   0x7   :  { %s1369_s29 = smov 0   ;;  %s1371_s30 = smov 0  }
   0x8 LB: > { %s1386_s9 = sadd.s32 4294967295, %s1305_s30   ;;  %s1086_s10 = sadd.s32 4294967294, %s1305_s30   ;;  %s1305_s30 = sphi %s1371_s30, %s1722_s30   ;;  %s1301_s29 = sphi %s1369_s29, %s1721_s29   ;;  %s1297_s28 = sphi %s1367_s28, %s1720_s28   ;;  %s1293_s27 = sphi %s1365_s27, %s1719_s27  }
   0x9   : > { %s1390_s11 = sadd.s32 1, %s1305_s30   ;;  %s190_s12 = sadd.s32 1, %s1301_s29 }
   0xa   : > { %s187_s13 = ssub.s32 %s1305_s30, %s1390_s11  ;;  %p200_p0 = scmp.ne.s32.totalorder %s1301_s29, %s1297_s28 }
   0xb   : > { %p188_p1 = scmp.eq.s32.totalorder %s187_s13, 0  ;;  %p201_p2 = scmp.eq.s32.totalorder %s1386_s9, 1 }
   0xc   : > { %p206_p3 = scmp.ne.s32.totalorder %s1297_s28, %s1293_s27  ;;  %p207_p4 = scmp.eq.s32.totalorder %s1086_s10, 1 }
   0xd   : > { %s1401_s14 = scalar_select %p188_p1, %s1301_s29, %s190_s12  }
   0xe   : > { %p1403_p5 = por %p201_p2, %p200_p0  ;;  %p1407_p6 = por %p207_p4, %p206_p3 }
   0xf   : > { %p1087_p7 = scmp.ge.s32.totalorder %s1305_s30, 1  ;;  %p240_p8 = scmp.lt.s32.totalorder %s1305_s30, 3 }
  0x10   : > { %p1138_p9 = scmp.eq.s32.totalorder %s1386_s9, 0  ;;  %s265_s20 = sshll.u32 %s1699_s6, 4  ;;  %s266_s20 = int_to_ptr.vmem [resolvable:$true] %s265_s20 }
  0x11   : > { %p1414_p10 = pnand %p1087_p7, %p240_p8  ;;  %s1196_s21 = scalar_lea.vmem %s266_s20, 16 }
  0x12   : > { %p1197_p13 = scmp.ne.s32.totalorder %s266_s20, %s1196_s21  ;;  %p1204_p3 = scmp.lt.s32.totalorder %s266_s20, %s266_s20 }
  0x13   : > { %p1127_p11 = pneg %p1414_p10  ;;  %p1205_p4 = scmp.lt.s32.totalorder %s1196_s21, %s1196_s21 }
  0x15   : > { %p1128_p12 = pnand %p1138_p9, %p1127_p11  ;;  %p1206_p7 = por %p1205_p4, %p1204_p3 }
  0x17   : > { %p1198_p0 = pneg %p1128_p12 }
  0x19   : > { %p1199_p1 = pnand %p1198_p0, %p1197_p13 }
  0x1b   : > { %p1200_p2 = pneg %p1199_p1 }
  0x1d   : > { %p1207_p8 = pnand %p1206_p7, %p1200_p2 }
  0x1f   : > { %1210 = shalt.err (!%p1207_p8)
}
  0x20   : > { %s1307_s22 = smov [#allocation2]   ;;  %294 = sbr.rel (%p1414_p10) target bundleno = 449 (0x1c1), region = 48 }
  0x21   : > { %1130 = dma.vmem_to_smem (!%p1128_p12), %s266_s20, 16, %s1307_s22, [#allocation4]  }
  0x25   : > { %1280 = dma.done.wait (%p1138_p9), [#allocation4], 16  }
  0x26   : > { %1282 = vsyncadd (%p1138_p9), [#allocation4], 4294967280 }
  0x27   : > { %300 = sfence }
  0x28   : > { %p339_p11 = scmp.lt.s32.totalorder %s1386_s9, 1  ;;  %v1308_v0 = vmov 0.0   ;;  %s1708_s0 = sld [smem:[#allocation11_spill]]  ;;  %vm355_vm0 = vcmask 1043456   ;;  %v446_v8 = vld [vmem:[%s1696_s3] sm:$0xff]  ;;  %vm450_vm1 = vcmask 31744  }
  0x29   : > { %525 = vmatprep.mubr.f32.mxu0 %v1308_v0  ;;  %614 = vmatprep.mubr.f32.mxu1 %v1308_v0  ;;  %v444_v13 = vld [vmem:[%s1695_s2] sm:$0xff]  ;;  %v447_v22 = vld [vmem:[%s1696_s3 + $0x8] sm:$0xff]  ;;  %s1309_s26 = smov 17   ;;  %s1311_s12 = smov 15  }
  0x2a   : > { %s340_s23 = scalar_select %p339_p11, %s1386_s9, 1  ;;  %v445_v25 = vld [vmem:[%s1695_s2 + $0x8] sm:$0xff] }
  0x2b   : > { %s1312_s13 = smov 1   ;;  %s1314_s18 = smov 113  }
  0x2c   : > { %s1115_s24 = sshll.u32 %s340_s23, 3  ;;  %s1315_s19 = smov 112  }
  0x2d   : > { %s348_s10 = scalar_lea.vmem %s1694_s1, %s1115_s24  ;;  %s1316_s20 = smov 111  }
  0x2e   : > { %s343_s17 = scalar_lea.vmem %s1708_s0, %s1115_s24  ;;  %v350_v1 = vld [vmem:[%s348_s10] sm:$0xff]  ;;  %s1310_s10 = smov 16  }
  0x2f   : > { %v349_v2 = vld [vmem:[%s343_s17] sm:$0xff]  ;;  %v388_v3 = vmul.f32 %v350_v1, %v350_v1  ;;  %v449_v4 = vcombine.high %v350_v1, %v350_v1  ;;  %s1313_s17 = smov 127   ;;  %s1098_s21 = sld [smem:[#allocation2 + $0x1]] }
  0x30   : > { %v351_v5 = vmul.f32 %v350_v1, %v349_v2  ;;  %v370_v6 = vmul.f32 %v349_v2, %v349_v2  ;;  %v539_v7 = vcombine.high %v349_v2, %v349_v2  ;;  %s1494_s22 = sand.u32 1, %s1297_s28   ;;  %s1702_s24 = sshll.u32 %s1386_s9, 5 }
  0x31   : > { %v390_v9 = vcombine.high %v388_v3, %v388_v3  ;;  %v392_v10 = vsel %vm355_vm0, %v388_v3, 0.0  ;;  %1099 = vmatprep.subr.msk.mxu0 %vm355_vm0, %v449_v4  ;;  %s1703_s23 = sshll.u32 %s1494_s22, 1 }
  0x32   : > { %v353_v11 = vcombine.high %v351_v5, %v351_v5  ;;  %v1445_v12 = vsel %vm355_vm0, %v351_v5, 0.0  ;;  %v393_v14 = vrot.slane %v392_v10, 4  ;;  %v372_v15 = vcombine.high %v370_v6, %v370_v6  ;;  %1103 = vmatprep.subr.msk.mxu1 %vm355_vm0, %v539_v7  ;;  %1100 = vmatpush1.msk.msra.mxu0 %vm355_vm0, %v350_v1  ;;  %s331_s25 = scalar_lea.vmem [#allocation5], %s1703_s23 }
  0x33   : > { %v374_v16 = vsel %vm355_vm0, %v370_v6, 0.0  ;;  %v399_v17 = vsel %vm355_vm0, %v390_v9, 0.0  ;;  %1104 = vmatpush1.msk.msra.mxu1 %vm355_vm0, %v349_v2  ;;  %1101 = vmatmul.mubr.msk.f32.vlgmr.msra.gmra.mxu0 %vm450_vm1, %v446_v8  ;;  %v357_v3 = vrot.slane %v1445_v12, 4 }
  0x34   : > { %v1455_v18 = vsel %vm355_vm0, %v353_v11, 0.0  ;;  %v375_v19 = vrot.slane %v374_v16, 4  ;;  %v394_v20 = vadd.f32 %v393_v14, %v392_v10  ;;  %v400_v21 = vrot.slane %v399_v17, 4  ;;  %1105 = vmatmul.mubr.msk.f32.vlgmr.msra.gmra.mxu1 %vm450_vm1, %v444_v13  ;;  %531 = vmatprep.mubr.f32.mxu0 %v1308_v0 }
  0x35   : > { %v381_v24 = vsel %vm355_vm0, %v372_v15, 0.0  ;;  %620 = vmatprep.mubr.f32.mxu1 %v1308_v0  ;;  %v358_v8 = vadd.f32 %v357_v3, %v1445_v12  ;;  %v364_v9 = vrot.slane %v1455_v18, 4 }
  0x36   : > { %v376_v23 = vadd.f32 %v375_v19, %v374_v16  ;;  %v395_v26 = vrot.slane %v394_v20, 2  ;;  %v401_v27 = vadd.f32 %v400_v21, %v399_v17  ;;  %v382_v29 = vrot.slane %v381_v24, 4 }
  0x37   : > { %1102 = vmatmul.mubr.msk.f32.gmra.mxu0 %vm450_vm1, %v447_v22  ;;  %v359_v14 = vrot.slane %v358_v8, 2  ;;  %v365_v15 = vadd.f32 %v364_v9, %v1455_v18  ;;  %v415_v19 = vstv %s1098_s21  ;;  %v427_v18 = vlaneseq }
  0x38   : > { %v377_v28 = vrot.slane %v376_v23, 2  ;;  %v396_v30 = vadd.f32 %v395_v26, %v394_v20  ;;  %v402_v31 = vrot.slane %v401_v27, 2  ;;  %1106 = vmatmul.mubr.msk.f32.gmra.mxu1 %vm450_vm1, %v445_v25  ;;  %v383_v33 = vadd.f32 %v382_v29, %v381_v24 }
  0x39   : > { %v360_v16 = vadd.f32 %v359_v14, %v358_v8  ;;  %v366_v17 = vrot.slane %v365_v15, 2  ;;  %vm1503_vm2 = vcmp.lt.s32.totalorder %v427_v18, 256 }
  0x3a   : > { %v378_v32 = vadd.f32 %v377_v28, %v376_v23  ;;  %v397_v34 = vrot.slane %v396_v30, 1  ;;  %v403_v35 = vadd.f32 %v402_v31, %v401_v27  ;;  %v384_v37 = vrot.slane %v383_v33, 2 }
  0x3b   : > { %v361_v20 = vrot.slane %v360_v16, 1  ;;  %v367_v12 = vadd.f32 %v366_v17, %v365_v15  ;;  %v1317_v27 = vmov 1966171168  }
  0x3c   : > { %v379_v36 = vrot.slane %v378_v32, 1  ;;  %v398_v38 = vadd.f32 %v397_v34, %v396_v30  ;;  %v404_v39 = vrot.slane %v403_v35, 1  ;;  %v385_v41 = vadd.f32 %v384_v37, %v383_v33 }
  0x3d   : > { %v362_v21 = vadd.f32 %v361_v20, %v360_v16  ;;  %v368_v22 = vrot.slane %v367_v12, 1  ;;  %v425_v28 = vunpack.c.l.s4 %v1317_v27 }
  0x3e   : > { %v380_v40 = vadd.f32 %v379_v36, %v378_v32  ;;  %v405_v42 = vadd.f32 %v404_v39, %v403_v35  ;;  %v386_v43 = vrot.slane %v385_v41, 1  ;;  %v428_v32 = vshrl.u32 %v427_v18, 7 }
  0x3f   : > { %v369_v25 = vadd.f32 %v368_v22, %v367_v12  ;;  %v426_v31 = vunpack.c.0.s8 %v425_v28 }
  0x40   : > { %v406_v44 = vmul.f32 %v398_v38, %v380_v40  ;;  %v387_v45 = vadd.f32 %v386_v43, %v385_v41 }
  0x41   : > { %v1497_v37 = vsub.s32 %v426_v31, %v428_v32 }
  0x42   : > { %v407_v46 = vmul.f32 %v405_v42, %v387_v45  ;;  %v408_v10 = vmax.f32 %v406_v44, 1e-16 }
  0x44   : > { %v409_v13 = vmax.f32 %v407_v46, 1e-16  ;;  %1186 = vrsqrt.f32 %v408_v10 }
  0x46   : > { %1188 = vrsqrt.f32 %v409_v13 }
  0x47   : > { %1190 = vrcp.f32 %v415_v19 }
  0x51   : > { %v1187_v23 = vpop.eup %1186 }
  0x52   : > { %v412_v26 = vmul.f32 %v1187_v23, %v362_v21 }
  0x53   : > { %v1189_v24 = vpop.eup %1188 }
  0x54   : > { %v413_v29 = vmul.f32 %v1189_v24, %v369_v25  ;;  %v1191_v30 = vpop.eup %1190 }
  0x55   : > { %v417_v33 = vmul.f32 %v1191_v30, %v412_v26 }
  0x56   : > { %v418_v34 = vmul.f32 %v1191_v30, %v413_v29 }
  0x57   : > { %v419_v35 = vsub.f32 1.0, %v417_v33 }
  0x58   : > { %v420_v36 = vsub.f32 1.0, %v418_v34 }
  0x5a   : > { %v423_v38 = vcombine.low %v419_v35, %v420_v36 }
  0x5c   : > { %v430_v39 = vrot.slane %v423_v38, %v1497_v37 }
  0x5e   : > { %v437_v41 = vrot.slane %v430_v39, %v1497_v37 }
  0x60   : > { %443 = vst.msk [vmem:[%s331_s25] sm:$0x3] %vm1503_vm2, %v437_v41 }
  0xf3   : > { %v527_v47 = vpop.f32.mrf.mxu0 }
  0xf4   : > { %v616_v48 = vpop.f32.mrf.mxu1 }
  0xf5   : > { %v1469_v49 = vadd.f32 %v616_v48, %v527_v47  ;;  %v529_v50 = vpop.f32.mrf.mxu0 }
  0xf6   : > { %v618_v51 = vpop.f32.mrf.mxu1 }
  0xf7   : > { %v1471_v52 = vadd.f32 %v618_v51, %v529_v50  ;;  %631 = vrot.lane.b32.xlu0 %v1469_v49, %s1309_s26  ;;  %v671_v53 = vrot.slane %v1469_v49, 1  ;;  %v706_v56 = vrot.slane %v1469_v49, 2  ;;  %v742_v58 = vrot.slane %v1469_v49, 3  ;;  %v533_v0 = vpop.f32.mrf.mxu0 }
  0xf8   : > { %v798_v60 = vrot.slane %v1469_v49, 5  ;;  %v831_v62 = vrot.slane %v1469_v49, 6  ;;  %v622_v1 = vpop.f32.mrf.mxu1  ;;  %v868_v2 = vrot.slane %v1469_v49, 7 }
  0xf9   : > { %675 = vrot.lane.b32.xlu1 %v671_v53, %s1310_s10  ;;  %v672_v54 = vrot.slane %v1471_v52, 1  ;;  %v780_v55 = vcombine.high %v1469_v49, %v1471_v52  ;;  %v707_v57 = vrot.slane %v1471_v52, 2  ;;  %v743_v59 = vrot.slane %v1471_v52, 3  ;;  %v535_v6 = vpop.f32.mrf.mxu0 }
  0xfa   : > { %v799_v61 = vrot.slane %v1471_v52, 5  ;;  %v832_v63 = vrot.slane %v1471_v52, 6  ;;  %v623_v4 = vadd.f32 %v622_v1, %v533_v0  ;;  %v869_v5 = vrot.slane %v1471_v52, 7  ;;  %v624_v7 = vpop.f32.mrf.mxu1 }
  0xfb   : > { %633 = vrot.lane.b32.xlu0 %v1471_v52, %s1309_s26  ;;  %v625_v11 = vadd.f32 %v624_v7, %v535_v6  ;;  %s957_s26 = sshll.u32 %s331_s25, 4  ;;  %s958_s26 = int_to_ptr.vmem [resolvable:$true] %s957_s26 }
  0xfd   : > { %677 = vrot.lane.b32.xlu1 %v672_v54, %s1310_s10 }
  0xff   : > { %710 = vrot.lane.b32.xlu0 %v706_v56, %s1311_s12 }
 0x101   : > { %712 = vrot.lane.b32.xlu1 %v707_v57, %s1311_s12 }
 0x103   : > { %746 = vrot.lane.b32.xlu0 %v742_v58, %s1312_s13 }
 0x105   : > { %748 = vrot.lane.b32.xlu1 %v743_v59, %s1312_s13  ;;  %s955_s13 = scalar_lea.hbm %s1700_s7, %s1702_s24 }
 0x107   : > { %802 = vrot.lane.b32.xlu0 %v798_v60, %s1313_s17 }
 0x109   : > { %804 = vrot.lane.b32.xlu1 %v799_v61, %s1313_s17  ;;  %s938_s17 = scalar_lea.sflag [#allocation3], %s1494_s22 }
 0x10b   : > { %835 = vrot.lane.b32.xlu0 %v831_v62, %s1314_s18 }
 0x10d   : > { %837 = vrot.lane.b32.xlu1 %v832_v63, %s1314_s18  ;;  %s1211_s18 = scalar_lea.vmem %s958_s26, 32 }
 0x10e   : > { %p1212_p9 = scmp.ne.s32.totalorder %s958_s26, %s1211_s18 }
 0x10f   : > { %872 = vrot.lane.b32.xlu0 %v868_v2, %s1315_s19 }
 0x110   : > { %p1213_p10 = pnand %p1212_p9, %p1403_p5 }
 0x111   : > { %874 = vrot.lane.b32.xlu1 %v869_v5, %s1315_s19  ;;  %s1318_s19 = smov [#allocation5]  }
 0x112   : > { %p1214_p12 = pneg %p1213_p10 }
 0x113   : > { %901 = vrot.lane.b32.xlu0 %v623_v4, %s1316_s20 }
 0x115   : > { %903 = vrot.lane.b32.xlu1 %v625_v11, %s1316_s20  ;;  %s1215_s20 = sshll.u32 %s1318_s19, 4  ;;  %s1216_s20 = int_to_ptr.vmem [resolvable:$false] %s1215_s20 }
 0x116   : > { %s1217_s21 = scalar_lea.vmem %s1216_s20, 64  ;;  %p1218_p13 = scmp.lt.s32.totalorder %s958_s26, %s1216_s20 }
 0x117   : > { %p1219_p0 = scmp.lt.s32.totalorder %s1217_s21, %s1211_s18 }
 0x119   : > { %p1220_p1 = por %p1219_p0, %p1218_p13 }
 0x11b   : > { %p1221_p2 = pnand %p1220_p1, %p1214_p12 }
 0x11d   : > { %1224 = shalt.err (!%p1221_p2)
}
 0x11e   : > { %s1225_s10 = scalar_lea.hbm %s955_s13, 32  ;;  %s1229_s24 = scalar_lea.hbm %s1700_s7, 64 }
 0x11f   : > { %p1226_p3 = scmp.ne.s32.totalorder %s955_s13, %s1225_s10  ;;  %p1230_p8 = scmp.lt.s32.totalorder %s955_s13, %s1700_s7 }
 0x120   : > { %p1231_p11 = scmp.lt.s32.totalorder %s1229_s24, %s1225_s10 }
 0x121   : > { %p1227_p4 = pnand %p1226_p3, %p1403_p5 }
 0x122   : > { %p1232_p9 = por %p1231_p11, %p1230_p8 }
 0x123   : > { %p1228_p7 = pneg %p1227_p4 }
 0x125   : > { %p1233_p10 = pnand %p1232_p9, %p1228_p7 }
 0x127   : > { %1236 = shalt.err (!%p1233_p10)
}
 0x128   : > { %1123 = dma.vmem_to_hbm [thread:$0]  (%p1403_p5), %s958_s26, 32, %s955_s13, %s938_s17   ;;  %v627_v42 = vld [vmem:[%s1697_s4] sm:$0x3]  ;;  %v1531_v43 = vand.u32 127, %v427_v18  ;;  %v787_v23 = vrot.slane %v780_v55, %v1497_v37 }
 0x129   : > { %v640_v44 = vadd.s32 4294967295, %v627_v42  ;;  %v1536_v46 = vld [vmem:[%s1698_s5] sm:$0x3]  ;;  %s1543_s0 = sld [smem:[#allocation2]]  ;;  %vm753_vm12 = vcmp.ge.s32.totalorder %v627_v42, 0  ;;  %vm754_vm13 = vcmp.lt.s32.totalorder %v627_v42, 16 }
 0x12a   : > { %v1539_v47 = vadd.s32 4294967295, %v1536_v46  ;;  %vm637_vm3 = vcmp.lt.s32.totalorder %v1531_v43, 17  ;;  %vm679_vm6 = vcmp.lt.s32.totalorder %v1531_v43, 16  ;;  %v1551_v60 = vadd.s32 1, %v1536_v46  ;;  %s1717_s23 = sshll.u32 %s1494_s22, 1  ;;  %s1718_s13 = sshll.u32 %s1386_s9, 5 }
 0x12b   : > { %vm641_vm4 = vcmp.ge.s32.totalorder %v640_v44, 0  ;;  %vm642_vm5 = vcmp.lt.s32.totalorder %v640_v44, 16  ;;  %vm714_vm11 = vcmp.lt.s32.totalorder %v1531_v43, 15  ;;  %vm682_vm15 = vcmp.ge.s32.totalorder %v1536_v46, 0  ;;  %s338_s24 = scalar_lea.vmem [#allocation6], %s1717_s23  ;;  %s1655_s25 = scalar_lea.hbm %s1701_s8, %s1718_s13 }
 0x12c   : > { %vm1545_vm7 = vmand %vm641_vm4, %vm642_vm5  ;;  %vm645_vm8 = vcmp.ge.s32.totalorder %v1539_v47, 0  ;;  %vm647_vm10 = vcmp.lt.s32.totalorder %v1539_v47, 16  ;;  %vm718_vm0 = vcmp.ge.s32.totalorder %v1551_v60, 0  ;;  %vm684_vm4 = vcmp.lt.s32.totalorder %v1536_v46, 16  ;;  %s971_s26 = sshll.u32 %s338_s24, 4  ;;  %s943_s12 = scalar_lea.sflag [#allocation7], %s1494_s22  ;;  %s972_s26 = int_to_ptr.vmem [resolvable:$true] %s971_s26 }
 0x12d   : > { %vm646_vm9 = vmand %vm1545_vm7, %vm645_vm8  ;;  %v842_v16 = vadd.s32 1, %v627_v42  ;;  %v794_v35 = vrot.slane %v787_v23, %v1497_v37  ;;  %s1237_s18 = scalar_lea.vmem %s972_s26, 32  ;;  %s1319_s19 = smov [#allocation6]  }
 0x12e   : > { %vm648_vm14 = vmand %vm646_vm9, %vm647_vm10  ;;  %vm720_vm9 = vcmp.lt.s32.totalorder %v1551_v60, 16  ;;  %p1238_p12 = scmp.ne.s32.totalorder %s972_s26, %s1237_s18  ;;  %s1241_s20 = sshll.u32 %s1319_s19, 4  ;;  %s1242_s20 = int_to_ptr.vmem [resolvable:$false] %s1241_s20 }
 0x12f   : > { %vm683_vm1 = vmand %vm1545_vm7, %vm682_vm15  ;;  %v630_v7 = vstv %s1543_s0  ;;  %s1243_s9 = scalar_lea.vmem %s1242_s20, 64  ;;  %p1244_p1 = scmp.lt.s32.totalorder %s972_s26, %s1242_s20 }
 0x130   : > { %vm1573_vm5 = vmand %vm753_vm12, %vm754_vm13  ;;  %p1239_p13 = pnand %p1238_p12, %p1403_p5  ;;  %p1245_p2 = scmp.lt.s32.totalorder %s1243_s9, %s1237_s18 }
 0x131   : > { %vm756_vm12 = vmand %vm1573_vm5, %vm645_vm8 }
 0x132   : > { %p1240_p0 = pneg %p1239_p13  ;;  %p1246_p3 = por %p1245_p2, %p1244_p1 }
 0x134   : > { %p1247_p4 = pnand %p1246_p3, %p1240_p0 }
 0x169   : > { %v632_v45 = vpop.permute.xlu0 %631 }
 0x16b   : > { %v676_v48 = vpop.permute.xlu1 %675 }
 0x16d   : > { %v634_v50 = vpop.permute.xlu0 %633 }
 0x16e   : > { %v638_v53 = vsel %vm637_vm3, %v632_v45, %v634_v50  ;;  %v639_v54 = vsel %vm637_vm3, %v634_v50, %v632_v45  ;;  %vm750_vm3 = vcmp.lt.s32.totalorder %v1531_v43, 1 }
 0x16f   : > { %v651_v56 = vcombine.low %v639_v54, %v638_v53  ;;  %v678_v57 = vpop.permute.xlu1 %677 }
 0x170   : > { %v680_v58 = vsel %vm679_vm6, %v676_v48, %v678_v57  ;;  %v681_v59 = vsel %vm679_vm6, %v678_v57, %v676_v48  ;;  %vm719_vm6 = vmand %vm1545_vm7, %vm718_vm0  ;;  %vm806_vm7 = vcmp.lt.s32.totalorder %v1531_v43, 127 }
 0x171   : > { %v658_v61 = vrot.slane %v651_v56, %v1497_v37  ;;  %v688_v62 = vcombine.low %v681_v59, %v680_v58  ;;  %v711_v63 = vpop.permute.xlu0 %710  ;;  %vm721_vm13 = vmand %vm719_vm6, %vm720_vm9  ;;  %vm844_vm6 = vcmp.lt.s32.totalorder %v842_v16, 16 }
 0x173   : > { %v665_v0 = vrot.slane %v658_v61, %v1497_v37  ;;  %v695_v1 = vrot.slane %v688_v62, %v1497_v37  ;;  %v713_v2 = vpop.permute.xlu1 %712 }
 0x174   : > { %v715_v3 = vsel %vm714_vm11, %v711_v63, %v713_v2  ;;  %v716_v4 = vsel %vm714_vm11, %v713_v2, %v711_v63  ;;  %vm685_vm11 = vmand %vm683_vm1, %vm684_vm4  ;;  %vm839_vm1 = vcmp.lt.s32.totalorder %v1531_v43, 113 }
 0x175   : > { %v724_v5 = vcombine.low %v716_v4, %v715_v3  ;;  %v747_v6 = vpop.permute.xlu0 %746  ;;  %v667_v9 = vsel %vm648_vm14, %v665_v0, 0.0  ;;  %v702_v10 = vrot.slane %v695_v1, %v1497_v37  ;;  %vm757_vm14 = vmand %vm756_vm12, %vm647_vm10 }
 0x176   : > { %v668_v12 = vadd.f32 %v667_v9, %v630_v7 }
 0x177   : > { %v731_v11 = vrot.slane %v724_v5, %v1497_v37  ;;  %v749_v13 = vpop.permute.xlu1 %748  ;;  %v704_v21 = vsel %vm685_vm11, %v702_v10, 0.0  ;;  %vm778_vm11 = vmand %vm1573_vm5, %vm682_vm15 }
 0x178   : > { %v751_v14 = vsel %vm750_vm3, %v747_v6, %v749_v13  ;;  %v752_v15 = vsel %vm750_vm3, %v749_v13, %v747_v6  ;;  %vm843_vm3 = vcmp.ge.s32.totalorder %v842_v16, 0  ;;  %v705_v30 = vadd.f32 %v704_v21, %v668_v12 }
 0x179   : > { %v738_v17 = vrot.slane %v731_v11, %v1497_v37  ;;  %v760_v19 = vcombine.low %v752_v15, %v751_v14  ;;  %v803_v20 = vpop.permute.xlu0 %802  ;;  %vm1608_vm12 = vmand %vm843_vm3, %vm844_vm6  ;;  %vm905_vm6 = vcmp.lt.s32.totalorder %v1531_v43, 111 }
 0x17a   : > { %vm879_vm3 = vmand %vm1608_vm12, %vm682_vm15 }
 0x17b   : > { %v767_v22 = vrot.slane %v760_v19, %v1497_v37  ;;  %v805_v24 = vpop.permute.xlu1 %804  ;;  %v740_v27 = vsel %vm721_vm13, %v738_v17, 0.0  ;;  %vm876_vm13 = vcmp.lt.s32.totalorder %v1531_v43, 112  ;;  %vm908_vm15 = vmand %vm1608_vm12, %vm718_vm0 }
 0x17c   : > { %v807_v25 = vsel %vm806_vm7, %v803_v20, %v805_v24  ;;  %v808_v26 = vsel %vm806_vm7, %v805_v24, %v803_v20  ;;  %v741_v55 = vadd.f32 %v740_v27, %v705_v30  ;;  %vm809_vm7 = vmand %vm1573_vm5, %vm718_vm0 }
 0x17d   : > { %v774_v28 = vrot.slane %v767_v22, %v1497_v37  ;;  %v813_v18 = vcombine.low %v807_v25, %v808_v26  ;;  %v836_v29 = vpop.permute.xlu0 %835  ;;  %vm810_vm5 = vmand %vm809_vm7, %vm720_vm9 }
 0x17f   : > { %v776_v31 = vsel %vm757_vm14, %v774_v28, 0.0  ;;  %v820_v49 = vrot.slane %v813_v18, %v1497_v37  ;;  %v838_v52 = vpop.permute.xlu1 %837  ;;  %vm779_vm14 = vmand %vm778_vm11, %vm684_vm4 }
 0x180   : > { %v840_v33 = vsel %vm839_vm1, %v836_v29, %v838_v52  ;;  %v841_v34 = vsel %vm839_vm1, %v838_v52, %v836_v29  ;;  %v777_v39 = vadd.f32 %v776_v31, %v741_v55  ;;  %vm846_vm1 = vmand %vm1608_vm12, %vm645_vm8  ;;  %v796_v50 = vsel %vm779_vm14, %v794_v35, 0.0 }
 0x181   : > { %v850_v36 = vcombine.low %v840_v33, %v841_v34  ;;  %v873_v38 = vpop.permute.xlu0 %872  ;;  %v827_v41 = vrot.slane %v820_v49, %v1497_v37  ;;  %vm847_vm8 = vmand %vm846_vm1, %vm647_vm10 }
 0x182   : > { %v797_v54 = vadd.f32 %v796_v50, %v777_v39  ;;  %vm880_vm11 = vmand %vm879_vm3, %vm684_vm4 }
 0x183   : > { %v857_v42 = vrot.slane %v850_v36, %v1497_v37  ;;  %v875_v44 = vpop.permute.xlu1 %874  ;;  %v829_v56 = vsel %vm810_vm5, %v827_v41, 0.0  ;;  %vm909_vm10 = vmand %vm908_vm15, %vm720_vm9 }
 0x184   : > { %v877_v45 = vsel %vm876_vm13, %v873_v38, %v875_v44  ;;  %v878_v48 = vsel %vm876_vm13, %v875_v44, %v873_v38  ;;  %v830_v47 = vadd.f32 %v829_v56, %v797_v54 }
 0x185   : > { %v864_v51 = vrot.slane %v857_v42, %v1497_v37  ;;  %v883_v53 = vcombine.low %v877_v45, %v878_v48  ;;  %v902_v58 = vpop.permute.xlu0 %901 }
 0x187   : > { %v890_v57 = vrot.slane %v883_v53, %v1497_v37  ;;  %v904_v59 = vpop.permute.xlu1 %903  ;;  %v866_v63 = vsel %vm847_vm8, %v864_v51, 0.0 }
 0x188   : > { %v906_v61 = vsel %vm905_vm6, %v902_v58, %v904_v59  ;;  %v907_v62 = vsel %vm905_vm6, %v904_v59, %v902_v58  ;;  %v867_v3 = vadd.f32 %v866_v63, %v830_v47 }
 0x189   : > { %v897_v0 = vrot.slane %v890_v57, %v1497_v37  ;;  %v912_v43 = vcombine.low %v906_v61, %v907_v62 }
 0x18b   : > { %v899_v1 = vsel %vm880_vm11, %v897_v0, 0.0  ;;  %v919_v2 = vrot.slane %v912_v43, %v1497_v37 }
 0x18c   : > { %v900_v4 = vadd.f32 %v899_v1, %v867_v3 }
 0x18d   : > { %v926_v46 = vrot.slane %v919_v2, %v1497_v37 }
 0x18f   : > { %v928_v5 = vsel %vm909_vm10, %v926_v46, 0.0 }
 0x190   : > { %v929_v6 = vadd.f32 %v928_v5, %v900_v4 }
 0x192   : > { %v930_v7 = vsub.f32 0.0, %v929_v6 }
 0x194   : > { %v931_v8 = vmul.f32 1.442695, %v930_v7 }
 0x196   : > { %1192 = vpow2.f32 %v931_v8 }
 0x1a3   : > { %v1193_v9 = vpop.eup %1192 }
 0x1a4   : > { %v933_v10 = vadd.f32 1.0, %v1193_v9 }
 0x1a6   : > { %1194 = vrcp.f32 %v933_v10 }
 0x1b3   : > { %v1195_v37 = vpop.eup %1194 }
 0x1b4   : > { %936 = vst.msk [vmem:[%s338_s24] sm:$0x3] %vm1503_vm2, %v1195_v37 }
 0x1b5   : > { %1250 = shalt.err (!%p1247_p4)
}
 0x1b6   : > { %s1251_s21 = scalar_lea.hbm %s1655_s25, 32  ;;  %s1255_s23 = scalar_lea.hbm %s1701_s8, 64 }
 0x1b7   : > { %p1252_p7 = scmp.ne.s32.totalorder %s1655_s25, %s1251_s21  ;;  %p1256_p9 = scmp.lt.s32.totalorder %s1655_s25, %s1701_s8 }
 0x1b8   : > { %p1257_p10 = scmp.lt.s32.totalorder %s1255_s23, %s1251_s21 }
 0x1b9   : > { %p1253_p8 = pnand %p1252_p7, %p1403_p5 }
 0x1ba   : > { %p1258_p12 = por %p1257_p10, %p1256_p9 }
 0x1bb   : > { %p1254_p11 = pneg %p1253_p8 }
 0x1bd   : > { %p1259_p13 = pnand %p1258_p12, %p1254_p11 }
 0x1bf   : > { %1262 = shalt.err (!%p1259_p13)
}
 0x1c0   : > { %1124 = dma.vmem_to_hbm [thread:$0]  (%p1403_p5), %s972_s26, 32, %s1655_s25, %s943_s12  }
 0x1c1 PF: > { %p1140_p0 = scmp.ge.s32.totalorder %s1305_s30, 2  ;;  %s983_s17 = sand.u32 1, %s1293_s27  }
 0x1c2   : > { %s984_s10 = scalar_lea.sflag [#allocation3], %s983_s17 }
 0x1c3   : > { %p1132_p1 = pnand %p1140_p0, %p1407_p6 }
 0x1c5   : > { %p1133_p2 = pneg %p1132_p1 }
 0x1c7   : > { %1284 = dma.done.wait (%p1133_p2), %s984_s10, 32  }
 0x1c8   : > { %1286 = vsyncadd (%p1133_p2), %s984_s10, 4294967264  ;;  %s993_s18 = scalar_lea.sflag [#allocation7], %s983_s17 }
 0x1c9   : > { %1288 = dma.done.wait (%p1133_p2), %s993_s18, 32  }
 0x1ca   : > { %1290 = vsyncadd (%p1133_p2), %s993_s18, 4294967264  ;;  %p23_p5 = scmp.ge.s32.totalorder %s1390_s11, 4   ;;  %s1719_s27 = smov %s1297_s28 }
 0x1cb   : > { %s1720_s28 = smov %s1301_s29  ;;  %s1721_s29 = smov %s1401_s14 }
 0x1cc   : > { %s1722_s30 = smov %s1390_s11  ;;  %25 = sbr.rel (!%p23_p5) target bundleno = 8 (0x8), region = 108 }
 0x1d1   :  { %998 = vsyncpa [#allocation3], 1 }
 0x1d2   :  { %1000 = vsyncpa [#allocation3 + $0x1], 1 }
 0x1d3   :  { %1001 = vsyncpa [#allocation7], 1 }
 0x1d4   :  { %1003 = vsyncpa [#allocation7 + $0x1], 1 }
 0x1d5   :  { %1004 = vsyncpa [#allocation4], 1 }
 0x1d6   :  { %1006 = vsyncpa [#allocation4 + $0x1], 1 }

</bundles_post_ra>
